<compile_context>
chip_gen: v6e
topology: v6e:2x2x1
jax: 0.10.0
libtpu: 0.0.40
codegen_flags: <defaults>
</compile_context>

<pallas_src>
import numpy as np
import jax
import jax.numpy as jnp
from jax.experimental import pallas as pl
from jax.experimental.pallas import tpu as pltpu


def _rank1_conv_kernel(pt_ref, w_ref, s_ref, r_ref, o_ref):
    w = w_ref[...]                         # (C_out, K)  f32
    s = s_ref[0]                           # (1, K)      f32
    r = r_ref[0]                           # (C_out, 1)  f32
    # Fold both rank-1 scales into the tiny weight tile (O(C_out*K) f32 VPU work).
    w_scaled = ((w * s) * r).astype(jnp.bfloat16)
    # Conv-as-matmul on the MXU: (C_out, K) @ (K, tm) -> (C_out, tm), f32 accumulate.
    acc = jnp.dot(w_scaled, pt_ref[0], preferred_element_type=jnp.float32)
    o_ref[0] = acc.astype(o_ref.dtype)     # lane-dense store (last dim = tm)


def _im2col_t(x, KH, KW, stride, padding):
    """x: (N, C, H, W) -> P^T: (N, C*KH*KW, H_out*W_out), channel-major K."""
    xp = jnp.pad(x, ((0, 0), (0, 0), (padding, padding), (padding, padding)))
    N, C, Hp, Wp = xp.shape
    H_out = (Hp - KH) // stride + 1
    W_out = (Wp - KW) // stride + 1
    cols = []
    for kh in range(KH):
        for kw in range(KW):
            patch = jax.lax.slice(
                xp,
                (0, 0, kh, kw),
                (N, C, kh + (H_out - 1) * stride + 1, kw + (W_out - 1) * stride + 1),
                (1, 1, stride, stride))                  # (N, C, Ho, Wo)
            cols.append(patch)
    cols = jnp.stack(cols, axis=2)                       # (N, C, KH*KW, Ho, Wo)
    Pt = cols.reshape(N, C * KH * KW, H_out * W_out)     # (N, K, M)
    return Pt, H_out, W_out


def _pick_tm(M, K, C_out, vmem_budget_bytes=12 * 1024 * 1024):
    """Largest spatial tile that is a multiple of 128, divides M, and whose
    double-buffered bf16-P + f32-out footprint fits the budget. Falls back to
    the full-M block (always legal: equals the array dim) if M isn't 128-aligned."""
    if M % 128 != 0:
        return M
    bytes_per_col = 2 * (K * 2 + C_out * 4)   # 2x buffers: bf16 P column + f32 out column
    cap = max(128, (vmem_budget_bytes // bytes_per_col) // 128 * 128)
    tm, t = 128, 128
    while t <= min(M, cap):
        if M % t == 0:
            tm = t
        t += 128
    return tm


def rank1_bayesian_conv2d_fwd(x, params, *, kernel_size, stride, padding,
                              ensemble_size, first_layer, key):
    """Forward pass matching Rank1BayesianConv2d (rank1_distribution='normal',
    use_bias=False). Returns (output NCHW, (R, S))."""
    del kernel_size  # derived from weight shape
    w = params["conv_weight"]                  # (C_out, C_in, KH, KW)
    r_mean, s_mean = params["r"], params["s"]  # (E, C_out), (E, C_in)
    r_rho, s_rho = params["r_rho"], params["s_rho"]
    C_out, C_in, KH, KW = w.shape
    E = ensemble_size

    if first_layer:
        x = jnp.tile(x, (E, 1, 1, 1))          # torch .repeat(E,1,1,1)
    N = x.shape[0]
    num_ex = N // E

    # Numerically safe softplus(rho) + 1e-6, reparameterized normal sampling (glue).
    r_sigma = jax.nn.softplus(r_rho) + 1e-6
    s_sigma = jax.nn.softplus(s_rho) + 1e-6
    k_r, k_s = jax.random.split(key)
    eps_r = jax.random.normal(k_r, (num_ex, E, C_out), jnp.float32)
    eps_s = jax.random.normal(k_s, (num_ex, E, C_in), jnp.float32)
    r_sample = r_mean[None] + r_sigma[None] * eps_r      # (num_ex, E, C_out)
    s_sample = s_mean[None] + s_sigma[None] * eps_s      # (num_ex, E, C_in)
    # permute(1,0,2).reshape(-1, F): ensemble-major ordering, matching x tiling
    R = jnp.transpose(r_sample, (1, 0, 2)).reshape(N, C_out)
    S = jnp.transpose(s_sample, (1, 0, 2)).reshape(N, C_in)
    # TODO(synk): 'cauchy' rank1_distribution and use_bias=True branches not implemented.

    # Cast to bf16 before im2col: the 9x-expanded patch array is written once, in bf16.
    Pt, H_out, W_out = _im2col_t(x.astype(jnp.bfloat16), KH, KW, stride, padding)
    M = H_out * W_out
    K = C_in * KH * KW
    Wt = w.reshape(C_out, K)                   # (C_out, K), channel-major K (matches Pt)
    s_full = jnp.repeat(S, KH * KW, axis=1).reshape(N, 1, K)   # tiny (N, K) side array
    r_full = R.reshape(N, C_out, 1)

    tm = _pick_tm(M, K, C_out)
    grid = (N, M // tm)

    out = pl.pallas_call(
        _rank1_conv_kernel,
        out_shape=jax.ShapeDtypeStruct((N, C_out, M), jnp.float32),
        grid_spec=pltpu.PrefetchScalarGridSpec(
            num_scalar_prefetch=0,
            grid=grid,
            in_specs=[
                pl.BlockSpec((1, K, tm), lambda n, m: (n, 0, m)),      # P^T tile (bf16)
                pl.BlockSpec((C_out, K), lambda n, m: (0, 0)),         # shared weights
                pl.BlockSpec((1, 1, K), lambda n, m: (n, 0, 0)),       # S (per sample)
                pl.BlockSpec((1, C_out, 1), lambda n, m: (n, 0, 0)),   # R (per sample)
            ],
            out_specs=pl.BlockSpec((1, C_out, tm), lambda n, m: (n, 0, m)),
        ),
        compiler_params=pltpu.CompilerParams(
            dimension_semantics=("parallel", "parallel"),
            vmem_limit_bytes=32 * 1024 * 1024),
    )(Pt, Wt, s_full, r_full)

    out = out.reshape(N, C_out, H_out, W_out)  # already NCHW; no transpose needed
    return out, (R, S)


if __name__ == "__main__":
    # module config: in=4, out=8, k=3, stride=1, pad=1, ensemble=2, first_layer=True
    C_in, C_out, KH, KW = 4, 8, 3, 3
    E = 2
    stride, padding = 1, 1
    B, H, W = 2, 16, 16

    key = jax.random.PRNGKey(0)
    k_w, k_r, k_s, k_rr, k_sr, k_x, k_noise = jax.random.split(key, 7)

    # deterministic parameter init mirroring initialize_parameters()
    fan_in = C_in * KH * KW
    conv_weight = jax.random.normal(k_w, (C_out, C_in, KH, KW), jnp.float32) * np.sqrt(2.0 / fan_in)
    # random_sign_initializer(probs=0.5): +-1 with prob 0.5
    r_mean = 2.0 * jax.random.bernoulli(k_r, 0.5, (E, C_out)).astype(jnp.float32) - 1.0
    s_mean = 2.0 * jax.random.bernoulli(k_s, 0.5, (E, C_in)).astype(jnp.float32) - 1.0
    p_drop = 0.001  # dropout_rate_init for 'normal'
    stddev_init = float(np.log(np.expm1(np.sqrt(p_drop / (1.0 - p_drop)))))
    r_rho = stddev_init + 0.1 * jax.random.truncated_normal(k_rr, -2.0, 2.0, (E, C_out), jnp.float32)
    s_rho = stddev_init + 0.1 * jax.random.truncated_normal(k_sr, -2.0, 2.0, (E, C_in), jnp.float32)

    params = dict(conv_weight=conv_weight, r=r_mean, s=s_mean, r_rho=r_rho, s_rho=s_rho)

    x = jax.random.normal(k_x, (B, C_in, H, W), jnp.float32)   # NCHW like PyTorch

    out, (R, S) = rank1_bayesian_conv2d_fwd(
        x, params, kernel_size=KH, stride=stride, padding=padding,
        ensemble_size=E, first_layer=True, key=k_noise)
    out = jax.block_until_ready(out)
    assert out.shape == (B * E, C_out, H, W)

    # plain-JAX f32 reference: conv(x * S) * R
    x_rep = jnp.tile(x, (E, 1, 1, 1))
    ref = jax.lax.conv_general_dilated(
        x_rep * S[:, :, None, None], conv_weight, (stride, stride),
        [(padding, padding), (padding, padding)],
        dimension_numbers=("NCHW", "OIHW", "NCHW")) * R[:, :, None, None]
    # Kernel uses bf16 MXU operands (f32 accumulation) -> bf16-appropriate tolerance.
    np.testing.assert_allclose(np.asarray(out), np.asarray(ref), rtol=2e-2, atol=3e-2)

    print("KERNEL_OK")
</pallas_src>

<mosaic_0001>
module attributes {stable_mosaic.version = 11 : i64} {
  func.func @_rank1_conv_kernel(%arg0: i32, %arg1: i32, %arg2: memref<1x36x256xbf16, #tpu.memory_space<vmem>>, %arg3: memref<8x36xf32, #tpu.memory_space<vmem>>, %arg4: memref<1x1x36xf32, #tpu.memory_space<vmem>>, %arg5: memref<1x8x1xf32, #tpu.memory_space<vmem>>, %arg6: memref<1x8x256xf32, #tpu.memory_space<vmem>>) attributes {dimension_semantics = [#tpu.dimension_semantics<parallel>, #tpu.dimension_semantics<parallel>], iteration_bounds = array<i64: 4, 1>, scalar_prefetch = 0 : i64, scratch_operands = 0 : i64, tpu.core_type = #tpu.core_type<tc>, window_params = [{transform_indices = @transform_0, window_bounds = array<i64: 1, 36, 256>}, {pipeline_mode = #tpu.pipeline_mode<synchronous>, transform_indices = @transform_1, window_bounds = array<i64: 8, 36>}, {transform_indices = @transform_2, window_bounds = array<i64: 1, 1, 36>}, {transform_indices = @transform_3, window_bounds = array<i64: 1, 8, 1>}, {transform_indices = @transform_4, window_bounds = array<i64: 1, 8, 256>}]} {
    %c0 = arith.constant 0 : index
    %c0_0 = arith.constant 0 : index
    %0 = vector.load %arg3[%c0, %c0_0] : memref<8x36xf32, #tpu.memory_space<vmem>>, vector<8x36xf32>
    %c0_1 = arith.constant 0 : index
    %c0_2 = arith.constant 0 : index
    %c0_3 = arith.constant 0 : index
    %1 = vector.load %arg4[%c0_1, %c0_2, %c0_3] : memref<1x1x36xf32, #tpu.memory_space<vmem>>, vector<1x1x36xf32>
    %2 = vector.shape_cast %1 : vector<1x1x36xf32> to vector<1x36xf32>
    %c0_4 = arith.constant 0 : index
    %c0_5 = arith.constant 0 : index
    %c0_6 = arith.constant 0 : index
    %3 = vector.load %arg5[%c0_4, %c0_5, %c0_6] : memref<1x8x1xf32, #tpu.memory_space<vmem>>, vector<1x8x1xf32>
    %4 = vector.shape_cast %3 : vector<1x8x1xf32> to vector<8x1xf32>
    %5 = vector.broadcast %2 : vector<1x36xf32> to vector<8x36xf32>
    %6 = arith.mulf %0, %5 : vector<8x36xf32>
    %7 = vector.broadcast %4 : vector<8x1xf32> to vector<8x36xf32>
    %8 = arith.mulf %6, %7 : vector<8x36xf32>
    %9 = arith.truncf %8 : vector<8x36xf32> to vector<8x36xbf16>
    %c0_7 = arith.constant 0 : index
    %c0_8 = arith.constant 0 : index
    %c0_9 = arith.constant 0 : index
    %10 = vector.load %arg2[%c0_7, %c0_8, %c0_9] : memref<1x36x256xbf16, #tpu.memory_space<vmem>>, vector<1x36x256xbf16>
    %11 = vector.shape_cast %10 : vector<1x36x256xbf16> to vector<36x256xbf16>
    %cst = arith.constant dense<0.000000e+00> : vector<8x256xf32>
    %12 = tpu.matmul %9, %11, %cst {dimension_numbers = #tpu.dot_dimension_numbers<[1], [0], [0], [1], [0, 0, 1, 1], [], []>} : vector<8x36xbf16>, vector<36x256xbf16>, vector<8x256xf32> -> vector<8x256xf32>
    %c0_10 = arith.constant 0 : index
    %c0_11 = arith.constant 0 : index
    %c0_12 = arith.constant 0 : index
    %13 = vector.load %arg6[%c0_10, %c0_11, %c0_12] : memref<1x8x256xf32, #tpu.memory_space<vmem>>, vector<1x8x256xf32>
    %14 = vector.shape_cast %13 : vector<1x8x256xf32> to vector<8x256xf32>
    %15 = vector.shape_cast %12 : vector<8x256xf32> to vector<1x8x256xf32>
    tpu.vector_store %arg6[%c0_10, %c0_11, %c0_12], %15 {strides = array<i32>} : memref<1x8x256xf32, #tpu.memory_space<vmem>>, vector<1x8x256xf32>,
    return
  }
  func.func @transform_0(%arg0: i32, %arg1: i32) -> (i32, i32, i32) {
    %c0_i32 = arith.constant 0 : i32
    %c0_i32_0 = arith.constant 0 : i32
    return %arg0, %c0_i32, %arg1 : i32, i32, i32
  }
  func.func @transform_1(%arg0: i32, %arg1: i32) -> (i32, i32) {
    %c0_i32 = arith.constant 0 : i32
    %c0_i32_0 = arith.constant 0 : i32
    %c0_i32_1 = arith.constant 0 : i32
    return %c0_i32, %c0_i32_0 : i32, i32
  }
  func.func @transform_2(%arg0: i32, %arg1: i32) -> (i32, i32, i32) {
    %c0_i32 = arith.constant 0 : i32
    %c0_i32_0 = arith.constant 0 : i32
    %c0_i32_1 = arith.constant 0 : i32
    return %arg0, %c0_i32, %c0_i32_0 : i32, i32, i32
  }
  func.func @transform_3(%arg0: i32, %arg1: i32) -> (i32, i32, i32) {
    %c0_i32 = arith.constant 0 : i32
    %c0_i32_0 = arith.constant 0 : i32
    %c0_i32_1 = arith.constant 0 : i32
    return %arg0, %c0_i32, %c0_i32_0 : i32, i32, i32
  }
  func.func @transform_4(%arg0: i32, %arg1: i32) -> (i32, i32, i32) {
    %c0_i32 = arith.constant 0 : i32
    %c0_i32_0 = arith.constant 0 : i32
    return %arg0, %c0_i32, %arg1 : i32, i32, i32
  }
}

</mosaic_0001>

<bundles_post_ra>
// kernel: tpu_custom_call.1
= control target key start
LH: loop header
LB: loop body
LE: loop exit
PB: predicated region body
PF: predicated region fallthrough
CT: control target
= control target key end

     0   :  { %9 = vsyncpa [#allocation3], 0  ;;  %s788_s0 = inlined_call_operand.vmem [shape: bf16[4,36,256], index: 0, kind: input, shape index: {}]   ;;  %s789_s1 = inlined_call_operand.vmem [shape: f32[8,36], index: 1, kind: input, shape index: {}]   ;;  %s790_s2 = inlined_call_operand.vmem [shape: f32[4,1,36], index: 2, kind: input, shape index: {}]   ;;  %s791_s3 = inlined_call_operand.vmem [shape: f32[4,8,1], index: 3, kind: input, shape index: {}]   ;;  %s792_s4 = inlined_call_operand.hbm [shape: f32[4,8,256], index: 4, kind: output, shape index: {}]  }
   0x1   :  { %11 = vsyncpa [#allocation3 + $0x1], 0  ;;  %s668_s15 = smov 0   ;;  %s670_s16 = smov 0  }
   0x2   :  { %s672_s17 = smov 0   ;;  %s674_s18 = smov 0  }
   0x3   :  { %s676_s19 = smov 0   ;;  %s678_s20 = smov 0  }
   0x4 LB: > { %s474_s21 = sadd.s32 4294967295, %s639_s20   ;;  %s475_s22 = sadd.s32 4294967294, %s639_s20   ;;  %s639_s20 = sphi %s678_s20, %s17_s20   ;;  %s635_s19 = sphi %s676_s19, %s799_s19   ;;  %s631_s18 = sphi %s674_s18, %s798_s18   ;;  %s627_s17 = sphi %s672_s17, %s797_s17   ;;  %s623_s16 = sphi %s670_s16, %s796_s16   ;;  %s619_s15 = sphi %s668_s15, %s795_s15  }
   0x5   : > { %s29_s23 = sadd.s32 1, %s635_s19  ;;  %s139_s24 = sadd.s32 1, %s627_s17 }
   0x6   : > { %p31_p0 = scmp.ge.s32.totalorder %s29_s23, 4  ;;  %p149_p1 = scmp.ne.s32.totalorder %s627_s17, %s623_s16 }
   0x7   : > { %p150_p2 = scmp.eq.s32.totalorder %s474_s21, 3  ;;  %p155_p3 = scmp.ne.s32.totalorder %s623_s16, %s619_s15 }
   0x8   : > { %s801_s23 = smov (%p31_p0, %s29_s23), 0  ;;  %p156_p5 = scmp.eq.s32.totalorder %s475_s22, 3 }
   0x9   : > { %p708_p4 = por %p150_p2, %p149_p1  ;;  %s134_s26 = ssub.s32 %s635_s19, %s801_s23 }
   0xa   : > { %p478_p6 = scmp.ge.s32.totalorder %s639_s20, 1  ;;  %p137_p7 = scmp.eq.s32.totalorder %s134_s26, 0 }
   0xb   : > { %p715_p8 = por %p156_p5, %p155_p3  ;;  %p203_p9 = scmp.lt.s32.totalorder %s639_s20, 5 }
   0xc   : > { %s721_s28 = scalar_select %p137_p7, %s627_s17, %s139_s24  }
   0xd   : > { %p204_p10 = pnand %p478_p6, %p203_p9 }
   0xe   : > { %p241_p11 = scmp.lt.s32.totalorder (!%p204_p10), %s631_s18, 3  ;;  %s237_s24 = sand.u32 (!%p204_p10), 1, %s623_s16  }
   0xf   : > { %207 = sbr.rel (%p204_p10) target bundleno = 362 (0x16a), region = 36  ;;  %s479_s26 = sshll.u32 (!%p204_p10), %s237_s24, 4 }
  0x10   : > { %s496_s6 = sshll.u32 (!%p204_p10), %s631_s18, 8  ;;  %s361_s9 = scalar_lea.sflag (!%p204_p10), [#allocation3], %s237_s24 }
  0x14   : > { %v641_v0 = vmov 0   ;;  %s242_s29 = scalar_select %p241_p11, %s631_s18, 3  ;;  %vm310_vm0 = vcmask 1041408   ;;  %v259_v10 = vld [vmem:[%s789_s1] sm:$0xff]  ;;  %vm306_vm1 = vcmask 293888  }
  0x15   : > { %554 = vset.pattern.permute.xlu0 %v641_v0  ;;  %349 = vmatprep.mubr.bf16.mxu0 %v641_v0  ;;  %s642_s18 = smov [#allocation2]  }
  0x16   : > { %s481_s30 = sshll.u32 %s242_s29, 3  ;;  %s497_s5 = smul.u32 40, %s242_s29 }
  0x17   : > { %s256_s8 = scalar_lea.vmem %s791_s3, %s481_s30  ;;  %s252_s14 = scalar_lea.vmem %s790_s2, %s242_s29 }
  0x18   : > { %v261_v1 = vld [vmem:[%s256_s8] sm:$0xff]  ;;  %s248_s11 = scalar_lea.vmem %s788_s0, %s497_s5  ;;  %s239_s30 = scalar_lea.vmem [#allocation2], %s479_s26 }
  0x19   : > { %271 = vperm.xlu0 %554, %v261_v1   ;;  %v280_v2 = vld [vmem:[%s248_s11 + $0x20] sm:$0x33]  ;;  %v557_v5 = vld [vmem:[%s248_s11 + $0x14] ss:$8 sps:$4 sm:$0xff]   ;;  %v559_v7 = vld [vmem:[%s248_s11 + $0x10] ss:$8 sps:$4 sm:$0xff]   ;;  %s744_s8 = scalar_lea.hbm %s792_s4, %s496_s6 }
  0x1a   : > { %v488_v3 = vcombine.high %v280_v2, %v280_v2  ;;  %v487_v4 = vcombine.low %v280_v2, %v280_v2  ;;  %v560_v8 = vld [vmem:[%s248_s11 + $0x4] ss:$8 sps:$4 sm:$0xff]   ;;  %v562_v9 = vld [vmem:[%s248_s11] ss:$8 sps:$4 sm:$0xff]   ;;  %s377_s5 = sshll.u32 %s239_s30, 4  ;;  %s567_s11 = sshll.u32 %s642_s18, 4  ;;  %s739_s5 = int_to_ptr.vmem [resolvable:$true] %s377_s5  ;;  %s568_s11 = int_to_ptr.vmem [resolvable:$false] %s567_s11 }
  0x1b   : > { %v482_v11 = vld [vmem:[%s252_s14] ss:$0 sm:$0xff]  ;;  %s563_s10 = scalar_lea.vmem %s739_s5, 256  ;;  %s569_s12 = scalar_lea.vmem %s568_s11, 512 }
  0x1c   : > { %489 = vmatprep.subr.msk.bf16.mxu0 %vm310_vm0, %v488_v3  ;;  %v312_v6 = vsel %vm310_vm0, %v487_v4, 0  ;;  %v268_v12 = vmul.f32 %v482_v11, %v259_v10  ;;  %p564_p12 = scmp.ne.s32.totalorder %s739_s5, %s563_s10  ;;  %p570_p1 = scmp.lt.s32.totalorder %s739_s5, %s568_s11 }
  0x1d   : > { %328 = vmatpush1.bf16.msra.mxu0 %v312_v6  ;;  %p571_p2 = scmp.lt.s32.totalorder %s569_s12, %s563_s10 }
  0x1e   : > { %329 = vmatprep.subr.bf16.mxu0 %v557_v5  ;;  %p565_p13 = pnand %p564_p12, %p708_p4 }
  0x1f   : > { %p572_p3 = por %p571_p2, %p570_p1 }
  0x20   : > { %p566_p0 = pneg %p565_p13 }
  0x21   : > { %330 = vmatpush1.bf16.msra.mxu0 %v559_v7 }
  0x22   : > { %331 = vmatprep.subr.bf16.mxu0 %v560_v8  ;;  %p573_p5 = pnand %p572_p3, %p566_p0 }
  0x25   : > { %332 = vmatpush1.bf16.msra.mxu0 %v562_v9 }
  0x94   : > { %v272_v13 = vpop.permute.xlu0 %271 }
  0x95   : > { %v274_v14 = vmul.f32 %v272_v13, %v268_v12 }
  0x97   : > { %v275_v15 = vpack.c.bf16 %v274_v14, %v274_v14 }
  0x99   : > { %490 = vmatmul.mubr.msk.bf16.vlgmr.msra.gmra.mxu0 %vm306_vm1, %v275_v15 }
 0x159   : > { %v351_v16 = vpop.f32.mrf.mxu0 }
 0x15a   : > { %358 = vst [vmem:[%s239_s30] sm:$0xff] %v351_v16 }
 0x15b   : > { %v353_v17 = vpop.f32.mrf.mxu0 }
 0x15c   : > { %359 = vst [vmem:[%s239_s30 + $0x8] sm:$0xff] %v353_v17 }
 0x15d   : > { %v355_v18 = vpop.f32.mrf.mxu0 }
 0x15e   : > { %576 = shalt.err (!%p573_p5)
}
 0x15f   : > { %s577_s13 = scalar_lea.hbm %s744_s8, 256  ;;  %s581_s22 = scalar_lea.hbm %s792_s4, 1024 }
 0x160   : > { %p578_p6 = scmp.ne.s32.totalorder %s744_s8, %s577_s13  ;;  %p582_p10 = scmp.lt.s32.totalorder %s744_s8, %s792_s4 }
 0x161   : > { %p583_p11 = scmp.lt.s32.totalorder %s581_s22, %s577_s13 }
 0x162   : > { %p579_p7 = pnand %p578_p6, %p708_p4 }
 0x163   : > { %p584_p12 = por %p583_p11, %p582_p10 }
 0x164   : > { %p580_p9 = pneg %p579_p7 }
 0x166   : > { %p585_p13 = pnand %p584_p12, %p580_p9 }
 0x168   : > { %588 = shalt.err (!%p585_p13)
}
 0x169   : > { %498 = dma.vmem_to_hbm [thread:$0]  (%p708_p4), %s739_s5, 256, %s744_s8, %s361_s9   ;;  %v356_v19 = vpop.f32.mrf.mxu0 }
 0x16a PF: > { %p504_p0 = scmp.ge.s32.totalorder %s639_s20, 2  ;;  %s389_s30 = sand.u32 1, %s619_s15  }
 0x16b   : > { %s390_s6 = scalar_lea.sflag [#allocation3], %s389_s30 }
 0x16c   : > { %p501_p1 = pnand %p504_p0, %p715_p8 }
 0x16e   : > { %p502_p2 = pneg %p501_p1 }
 0x170   : > { %614 = dma.done.wait (%p502_p2), %s390_s6, 256  }
 0x171   : > { %616 = vsyncadd (%p502_p2), %s390_s6, 4294967040  ;;  %s17_s20 = sadd.s32 1, %s639_s20   ;;  %s795_s15 = smov %s623_s16 }
 0x172   : > { %p14_p3 = scmp.ge.s32.totalorder %s17_s20, 6   ;;  %s796_s16 = smov %s627_s17 }
 0x173   : > { %s797_s17 = smov %s721_s28  ;;  %s798_s18 = smov %s635_s19 }
 0x174   : > { %s799_s19 = smov %s801_s23  ;;  %16 = sbr.rel (!%p14_p3) target bundleno = 4 (0x4), region = 77 }
 0x179   :  { %395 = vsyncpa [#allocation3], 1 }
 0x17a   :  { %397 = vsyncpa [#allocation3 + $0x1], 1 }

</bundles_post_ra>
